<compile_context>
chip_gen: v7x
topology: tpu7x:2x2x1
jax: 0.10.0
libtpu: 0.0.40
codegen_flags: <defaults>
</compile_context>

<pallas_src>
import functools

import jax
import jax.numpy as jnp
from jax.experimental import pallas as pl
from jax.experimental.pallas import tpu as pltpu

LN_EPS = 1e-5
LANES = 128   # lane width of every slab (inputs, weights, biases, output)
WBLK = 128    # contracting-dim padding (rows) of each weight block


# ----------------------------------------------------------------------------
# Kernel
# ----------------------------------------------------------------------------
def ffnn_kernel(io_ref, w_ref, b_ref, out_ref, *, dims, batch):
    input_dim, feat_dim, class_dim, num_classes = dims
    B = batch

    # Full-lane, sublane-aligned parameter blocks (no lane sub-slicing).
    w0 = w_ref[0 * WBLK:1 * WBLK, :]   # bf16 [128,128]; real part [in,   feat]
    w1 = w_ref[1 * WBLK:2 * WBLK, :]   # bf16 [128,128]; real part [feat, cls ]
    w2 = w_ref[2 * WBLK:3 * WBLK, :]   # bf16 [128,128]; real part [cls,  ncls]
    b0 = b_ref[0:1, :]                 # f32 (1,128), zero-padded lanes
    b1 = b_ref[1:2, :]
    b2 = b_ref[2:3, :]

    feats = io_ref[0:B, :]             # f32 (B,128); lanes >= input_dim   are 0
    labels = io_ref[B:2 * B, :]        # f32 (B,128); lanes >= num_classes are 0

    lane = jax.lax.broadcasted_iota(jnp.int32, (B, LANES), 1)

    def ln_static(x, n):
        # One-pass LayerNorm WITHOUT affine (gamma/beta folded into the next
        # Linear).  Padded lanes of x are exactly zero, so the static
        # denominator n is exact and the two sums are independent XLU reduces.
        s1 = jnp.sum(x, axis=-1, keepdims=True)
        s2 = jnp.sum(x * x, axis=-1, keepdims=True)
        mu = s1 / n
        var = s2 / n - mu * mu
        return (x - mu) * jax.lax.rsqrt(var + LN_EPS)

    # ln0 -> layer0 (*alpha folded) -> dropout(eval)=id -> ReLU
    # (junk in padded lanes of the normalized activation is annihilated by the
    #  zero-padded weight rows of the next block.)
    x = ln_static(feats, float(input_dim))
    h = jnp.dot(x.astype(jnp.bfloat16), w0, preferred_element_type=jnp.float32) + b0
    h = jnp.maximum(h, 0.0)            # lanes >= feat_dim stay exactly 0

    # ln1 -> layer1 (*alpha folded) -> dropout=id -> sigmoid
    h = ln_static(h, float(feat_dim))
    z = jnp.dot(h.astype(jnp.bfloat16), w1, preferred_element_type=jnp.float32) + b1
    # sigmoid(0) = 0.5 would pollute the padded lanes -> mask back to 0.
    z = jnp.where(lane < class_dim, jax.nn.sigmoid(z), 0.0)

    # ln2 -> layer2 (*alpha folded)
    z = ln_static(z, float(class_dim))
    logits = jnp.dot(z.astype(jnp.bfloat16), w2, preferred_element_type=jnp.float32) + b2
    # lanes >= num_classes of `logits` are exactly 0.

    # BCEWithLogitsLoss (mean over the B*num_classes real elements),
    # numerically stable form; padded lanes masked out (they'd contribute ln 2).
    per = (jnp.maximum(logits, 0.0) - logits * labels
           + jnp.log1p(jnp.exp(-jnp.abs(logits))))
    per = jnp.where(lane < num_classes, per, 0.0)
    loss = jnp.sum(per) / (B * num_classes)

    # Single lane-dense output: logits in lanes [0,num_classes), scalar loss
    # replicated down lane `num_classes`.  One unmasked full-width store.
    out_ref[...] = jnp.where(lane == num_classes, loss, logits)


# ----------------------------------------------------------------------------
# Wrapper
# ----------------------------------------------------------------------------
@functools.partial(jax.jit, static_argnames=("dims",))
def ffnn_forward(features, labels, wslab, bslab, dims):
    input_dim, feat_dim, class_dim, num_classes = dims
    B = features.shape[0]

    # Pack activations into one lane-dense slab: rows 0:B features, rows B:2B
    # labels (both zero-padded to 128 lanes) -> 1 input DMA instead of 2, and
    # no masked partial-tile loads in-kernel.
    io = jnp.zeros((2 * B, LANES), jnp.float32)
    io = io.at[0:B, 0:input_dim].set(features)
    io = io.at[B:2 * B, 0:num_classes].set(labels)

    vmem = pl.BlockSpec(memory_space=pltpu.MemorySpace.VMEM)

    flops = 2 * B * (input_dim * feat_dim + feat_dim * class_dim
                     + class_dim * num_classes)
    transcendentals = B * (LANES + 2 * num_classes + 3)
    bytes_accessed = (io.size * 4 + wslab.size * 2 + bslab.size * 4
                      + B * LANES * 4)

    slab = pl.pallas_call(
        functools.partial(ffnn_kernel, dims=dims, batch=B),
        out_shape=jax.ShapeDtypeStruct((B, LANES), jnp.float32),
        in_specs=[vmem, vmem, vmem],
        out_specs=vmem,
        cost_estimate=pl.CostEstimate(
            flops=flops, transcendentals=transcendentals,
            bytes_accessed=bytes_accessed),
    )(io, wslab, bslab)

    return {"loss": slab[0, num_classes], "logits": slab[:, :num_classes]}


# ----------------------------------------------------------------------------
# Parameter construction / folding / packing (wrapper-side, one-time cost)
# ----------------------------------------------------------------------------
def init_params(key, input_dim, feat_dim, class_dim, num_classes, alpha):
    """Module-layout params: kaiming-uniform weights (stored [in,out] for
    x @ W), zero biases, LayerNorm gamma=1 / beta=0, scalar alpha."""
    def kaiming_uniform(k, out_d, in_d):
        bound = jnp.sqrt(2.0) * jnp.sqrt(3.0 / in_d)  # relu gain
        w = jax.random.uniform(k, (out_d, in_d), jnp.float32, -bound, bound)
        return w.T  # -> [in, out]

    k0, k1, k2 = jax.random.split(key, 3)
    return {
        "w0": kaiming_uniform(k0, feat_dim, input_dim),
        "b0": jnp.zeros((1, feat_dim), jnp.float32),
        "w1": kaiming_uniform(k1, class_dim, feat_dim),
        "b1": jnp.zeros((1, class_dim), jnp.float32),
        "w2": kaiming_uniform(k2, num_classes, class_dim),
        "b2": jnp.zeros((1, num_classes), jnp.float32),
        "g0": jnp.ones((1, input_dim), jnp.float32),
        "be0": jnp.zeros((1, input_dim), jnp.float32),
        "g1": jnp.ones((1, feat_dim), jnp.float32),
        "be1": jnp.zeros((1, feat_dim), jnp.float32),
        "g2": jnp.ones((1, class_dim), jnp.float32),
        "be2": jnp.zeros((1, class_dim), jnp.float32),
        "alpha": jnp.full((1, 1), alpha, jnp.float32),
    }


def fold_params(p):
    """Fold alpha and each LayerNorm affine into the following Linear (exact):
    (x̂*γ+β)@W*α + b*α == x̂@(diag(γ)W α) + (βW + b) α."""
    a = p["alpha"][0, 0]
    return {
        "w0": (p["g0"].reshape(-1, 1) * p["w0"]) * a,
        "b0": (p["be0"] @ p["w0"] + p["b0"]) * a,
        "w1": (p["g1"].reshape(-1, 1) * p["w1"]) * a,
        "b1": (p["be1"] @ p["w1"] + p["b1"]) * a,
        "w2": (p["g2"].reshape(-1, 1) * p["w2"]) * a,
        "b2": (p["be2"] @ p["w2"] + p["b2"]) * a,
    }


def pack_params(eff, dims):
    """Pack folded params into one bf16 weight slab of three zero-padded
    [128,128] blocks and one f32 (8,128) bias slab."""
    input_dim, feat_dim, class_dim, num_classes = dims
    assert max(input_dim, feat_dim, class_dim, num_classes) <= LANES

    w = jnp.zeros((3 * WBLK, LANES), jnp.float32)
    w = w.at[0:input_dim, 0:feat_dim].set(eff["w0"])
    w = w.at[WBLK:WBLK + feat_dim, 0:class_dim].set(eff["w1"])
    w = w.at[2 * WBLK:2 * WBLK + class_dim, 0:num_classes].set(eff["w2"])

    b = jnp.zeros((8, LANES), jnp.float32)
    b = b.at[0, 0:feat_dim].set(eff["b0"].reshape(-1))
    b = b.at[1, 0:class_dim].set(eff["b1"].reshape(-1))
    b = b.at[2, 0:num_classes].set(eff["b2"].reshape(-1))
    return {"w": w.astype(jnp.bfloat16), "b": b}


# ----------------------------------------------------------------------------
# Pure-JAX references
# ----------------------------------------------------------------------------
def _ln_twopass(x, eps=LN_EPS):
    mu = jnp.mean(x, axis=-1, keepdims=True)
    var = jnp.mean((x - mu) ** 2, axis=-1, keepdims=True)
    return (x - mu) * jax.lax.rsqrt(var + eps)


def _ln_onepass(x, eps=LN_EPS):
    mu = jnp.mean(x, axis=-1, keepdims=True)
    var = jnp.mean(x * x, axis=-1, keepdims=True) - mu * mu
    return (x - mu) * jax.lax.rsqrt(var + eps)


def reference_forward_module(features, labels, p):
    """f32 reference matching the PyTorch forward (eval mode), no folding."""
    a = p["alpha"][0, 0]
    x = _ln_twopass(features) * p["g0"] + p["be0"]
    h = jnp.maximum((x @ p["w0"] + p["b0"]) * a, 0.0)
    h = _ln_twopass(h) * p["g1"] + p["be1"]
    z = jax.nn.sigmoid((h @ p["w1"] + p["b1"]) * a)
    z = _ln_twopass(z) * p["g2"] + p["be2"]
    logits = (z @ p["w2"] + p["b2"]) * a
    per = (jnp.maximum(logits, 0.0) - logits * labels
           + jnp.log1p(jnp.exp(-jnp.abs(logits))))
    return {"loss": jnp.mean(per), "logits": logits}


def reference_forward_folded(features, labels, eff):
    """Mirrors the kernel numerics (folded params, one-pass LN, bf16 MXU)."""
    def mm(x, w):
        return jnp.dot(x.astype(jnp.bfloat16), w.astype(jnp.bfloat16),
                       preferred_element_type=jnp.float32)
    h = jnp.maximum(mm(_ln_onepass(features), eff["w0"]) + eff["b0"], 0.0)
    z = jax.nn.sigmoid(mm(_ln_onepass(h), eff["w1"]) + eff["b1"])
    logits = mm(_ln_onepass(z), eff["w2"]) + eff["b2"]
    per = (jnp.maximum(logits, 0.0) - logits * labels
           + jnp.log1p(jnp.exp(-jnp.abs(logits))))
    return {"loss": jnp.mean(per), "logits": logits}


if __name__ == "__main__":
    B, input_dim, feat_dim, class_dim, num_classes = 8, 32, 64, 16, 10
    alpha = 0.5
    dims = (input_dim, feat_dim, class_dim, num_classes)

    key = jax.random.PRNGKey(0)
    kf, kl, kp = jax.random.split(key, 3)
    features = jax.random.normal(kf, (B, input_dim), jnp.float32)
    labels = (jax.random.uniform(kl, (B, num_classes)) > 0.5).astype(jnp.float32)

    params = init_params(kp, input_dim, feat_dim, class_dim, num_classes, alpha)
    eff = fold_params(params)
    packed = pack_params(eff, dims)

    out = ffnn_forward(features, labels, packed["w"], packed["b"], dims=dims)
    jax.block_until_ready(out["logits"])
    jax.block_until_ready(out["loss"])

    # 1) Exact-numerics check: same folded params / bf16 matmul / one-pass LN.
    ref_k = reference_forward_folded(features, labels, eff)
    assert jnp.allclose(out["logits"], ref_k["logits"], atol=1e-3, rtol=1e-3)
    assert jnp.allclose(out["loss"], ref_k["loss"], atol=1e-3, rtol=1e-3)

    # 2) Module-semantics check vs f32 unfolded reference; tolerance loosened
    #    because matmul operands are bf16 in the kernel.
    ref_m = reference_forward_module(features, labels, params)
    assert jnp.allclose(out["logits"], ref_m["logits"], atol=5e-2, rtol=5e-2)
    assert jnp.allclose(out["loss"], ref_m["loss"], atol=5e-2, rtol=5e-2)

    print("KERNEL_OK")
</pallas_src>

<mosaic_0001>
module attributes {stable_mosaic.version = 11 : i64} {
  func.func @ffnn_kernel(%arg0: memref<16x128xf32, #tpu.memory_space<vmem>>, %arg1: memref<384x128xbf16, #tpu.memory_space<vmem>>, %arg2: memref<8x128xf32, #tpu.memory_space<vmem>>, %arg3: memref<8x128xf32, #tpu.memory_space<vmem>>) attributes {dimension_semantics = [], scalar_prefetch = 0 : i64, scratch_operands = 0 : i64, tpu.core_type = #tpu.core_type<tc>} {
    %c0 = arith.constant 0 : index
    %c0_0 = arith.constant 0 : index
    %0 = vector.load %arg1[%c0, %c0_0] : memref<384x128xbf16, #tpu.memory_space<vmem>>, vector<128x128xbf16>
    %c128 = arith.constant 128 : index
    %c0_1 = arith.constant 0 : index
    %1 = vector.load %arg1[%c128, %c0_1] : memref<384x128xbf16, #tpu.memory_space<vmem>>, vector<128x128xbf16>
    %c256 = arith.constant 256 : index
    %c0_2 = arith.constant 0 : index
    %2 = vector.load %arg1[%c256, %c0_2] : memref<384x128xbf16, #tpu.memory_space<vmem>>, vector<128x128xbf16>
    %c0_3 = arith.constant 0 : index
    %c0_4 = arith.constant 0 : index
    %3 = vector.load %arg2[%c0_3, %c0_4] : memref<8x128xf32, #tpu.memory_space<vmem>>, vector<1x128xf32>
    %c1 = arith.constant 1 : index
    %c0_5 = arith.constant 0 : index
    %4 = vector.load %arg2[%c1, %c0_5] : memref<8x128xf32, #tpu.memory_space<vmem>>, vector<1x128xf32>
    %c2 = arith.constant 2 : index
    %c0_6 = arith.constant 0 : index
    %5 = vector.load %arg2[%c2, %c0_6] : memref<8x128xf32, #tpu.memory_space<vmem>>, vector<1x128xf32>
    %c0_7 = arith.constant 0 : index
    %c0_8 = arith.constant 0 : index
    %6 = vector.load %arg0[%c0_7, %c0_8] : memref<16x128xf32, #tpu.memory_space<vmem>>, vector<8x128xf32>
    %c8 = arith.constant 8 : index
    %c0_9 = arith.constant 0 : index
    %7 = vector.load %arg0[%c8, %c0_9] : memref<16x128xf32, #tpu.memory_space<vmem>>, vector<8x128xf32>
    %8 = tpu.iota {dimensions = array<i32: 1>} : vector<8x128xi32>
    %cst = arith.constant dense<0.000000e+00> : vector<8xf32>
    %9 = vector.multi_reduction <add>, %6, %cst [1] : vector<8x128xf32> to vector<8xf32>
    %10 = vector.shape_cast %9 : vector<8xf32> to vector<8x1xf32>
    %11 = arith.mulf %6, %6 : vector<8x128xf32>
    %cst_10 = arith.constant dense<0.000000e+00> : vector<8xf32>
    %12 = vector.multi_reduction <add>, %11, %cst_10 [1] : vector<8x128xf32> to vector<8xf32>
    %13 = vector.shape_cast %12 : vector<8xf32> to vector<8x1xf32>
    %cst_11 = arith.constant 3.200000e+01 : f32
    %14 = vector.broadcast %cst_11 : f32 to vector<8x1xf32>
    %15 = arith.divf %10, %14 : vector<8x1xf32>
    %cst_12 = arith.constant 3.200000e+01 : f32
    %16 = vector.broadcast %cst_12 : f32 to vector<8x1xf32>
    %17 = arith.divf %13, %16 : vector<8x1xf32>
    %18 = arith.mulf %15, %15 : vector<8x1xf32>
    %19 = arith.subf %17, %18 : vector<8x1xf32>
    %20 = vector.broadcast %15 : vector<8x1xf32> to vector<8x128xf32>
    %21 = arith.subf %6, %20 : vector<8x128xf32>
    %cst_13 = arith.constant 9.99999974E-6 : f32
    %22 = vector.broadcast %cst_13 : f32 to vector<8x1xf32>
    %23 = arith.addf %19, %22 : vector<8x1xf32>
    %24 = math.rsqrt %23 : vector<8x1xf32>
    %25 = vector.broadcast %24 : vector<8x1xf32> to vector<8x128xf32>
    %26 = arith.mulf %21, %25 : vector<8x128xf32>
    %27 = arith.truncf %26 : vector<8x128xf32> to vector<8x128xbf16>
    %cst_14 = arith.constant dense<0.000000e+00> : vector<8x128xf32>
    %28 = tpu.matmul %27, %0, %cst_14 {dimension_numbers = #tpu.dot_dimension_numbers<[1], [0], [0], [1], [0, 0, 1, 1], [], []>} : vector<8x128xbf16>, vector<128x128xbf16>, vector<8x128xf32> -> vector<8x128xf32>
    %29 = vector.broadcast %3 : vector<1x128xf32> to vector<8x128xf32>
    %30 = arith.addf %28, %29 : vector<8x128xf32>
    %cst_15 = arith.constant 0.000000e+00 : f32
    %31 = vector.broadcast %cst_15 : f32 to vector<8x128xf32>
    %32 = arith.maximumf %30, %31 : vector<8x128xf32>
    %cst_16 = arith.constant dense<0.000000e+00> : vector<8xf32>
    %33 = vector.multi_reduction <add>, %32, %cst_16 [1] : vector<8x128xf32> to vector<8xf32>
    %34 = vector.shape_cast %33 : vector<8xf32> to vector<8x1xf32>
    %35 = arith.mulf %32, %32 : vector<8x128xf32>
    %cst_17 = arith.constant dense<0.000000e+00> : vector<8xf32>
    %36 = vector.multi_reduction <add>, %35, %cst_17 [1] : vector<8x128xf32> to vector<8xf32>
    %37 = vector.shape_cast %36 : vector<8xf32> to vector<8x1xf32>
    %cst_18 = arith.constant 6.400000e+01 : f32
    %38 = vector.broadcast %cst_18 : f32 to vector<8x1xf32>
    %39 = arith.divf %34, %38 : vector<8x1xf32>
    %cst_19 = arith.constant 6.400000e+01 : f32
    %40 = vector.broadcast %cst_19 : f32 to vector<8x1xf32>
    %41 = arith.divf %37, %40 : vector<8x1xf32>
    %42 = arith.mulf %39, %39 : vector<8x1xf32>
    %43 = arith.subf %41, %42 : vector<8x1xf32>
    %44 = vector.broadcast %39 : vector<8x1xf32> to vector<8x128xf32>
    %45 = arith.subf %32, %44 : vector<8x128xf32>
    %cst_20 = arith.constant 9.99999974E-6 : f32
    %46 = vector.broadcast %cst_20 : f32 to vector<8x1xf32>
    %47 = arith.addf %43, %46 : vector<8x1xf32>
    %48 = math.rsqrt %47 : vector<8x1xf32>
    %49 = vector.broadcast %48 : vector<8x1xf32> to vector<8x128xf32>
    %50 = arith.mulf %45, %49 : vector<8x128xf32>
    %51 = arith.truncf %50 : vector<8x128xf32> to vector<8x128xbf16>
    %cst_21 = arith.constant dense<0.000000e+00> : vector<8x128xf32>
    %52 = tpu.matmul %51, %1, %cst_21 {dimension_numbers = #tpu.dot_dimension_numbers<[1], [0], [0], [1], [0, 0, 1, 1], [], []>} : vector<8x128xbf16>, vector<128x128xbf16>, vector<8x128xf32> -> vector<8x128xf32>
    %53 = vector.broadcast %4 : vector<1x128xf32> to vector<8x128xf32>
    %54 = arith.addf %52, %53 : vector<8x128xf32>
    %c16_i32 = arith.constant 16 : i32
    %55 = vector.broadcast %c16_i32 : i32 to vector<8x128xi32>
    %56 = arith.cmpi slt, %8, %55 : vector<8x128xi32>
    %57 = arith.negf %54 : vector<8x128xf32>
    %58 = math.exp %57 : vector<8x128xf32>
    %cst_22 = arith.constant 1.000000e+00 : f32
    %59 = vector.broadcast %cst_22 : f32 to vector<8x128xf32>
    %60 = arith.addf %59, %58 : vector<8x128xf32>
    %61 = arith.divf %59, %60 : vector<8x128xf32>
    %cst_23 = arith.constant 0.000000e+00 : f32
    %62 = vector.broadcast %cst_23 : f32 to vector<8x128xf32>
    %63 = arith.select %56, %61, %62 : vector<8x128xi1>, vector<8x128xf32>
    %cst_24 = arith.constant dense<0.000000e+00> : vector<8xf32>
    %64 = vector.multi_reduction <add>, %63, %cst_24 [1] : vector<8x128xf32> to vector<8xf32>
    %65 = vector.shape_cast %64 : vector<8xf32> to vector<8x1xf32>
    %66 = arith.mulf %63, %63 : vector<8x128xf32>
    %cst_25 = arith.constant dense<0.000000e+00> : vector<8xf32>
    %67 = vector.multi_reduction <add>, %66, %cst_25 [1] : vector<8x128xf32> to vector<8xf32>
    %68 = vector.shape_cast %67 : vector<8xf32> to vector<8x1xf32>
    %cst_26 = arith.constant 1.600000e+01 : f32
    %69 = vector.broadcast %cst_26 : f32 to vector<8x1xf32>
    %70 = arith.divf %65, %69 : vector<8x1xf32>
    %cst_27 = arith.constant 1.600000e+01 : f32
    %71 = vector.broadcast %cst_27 : f32 to vector<8x1xf32>
    %72 = arith.divf %68, %71 : vector<8x1xf32>
    %73 = arith.mulf %70, %70 : vector<8x1xf32>
    %74 = arith.subf %72, %73 : vector<8x1xf32>
    %75 = vector.broadcast %70 : vector<8x1xf32> to vector<8x128xf32>
    %76 = arith.subf %63, %75 : vector<8x128xf32>
    %cst_28 = arith.constant 9.99999974E-6 : f32
    %77 = vector.broadcast %cst_28 : f32 to vector<8x1xf32>
    %78 = arith.addf %74, %77 : vector<8x1xf32>
    %79 = math.rsqrt %78 : vector<8x1xf32>
    %80 = vector.broadcast %79 : vector<8x1xf32> to vector<8x128xf32>
    %81 = arith.mulf %76, %80 : vector<8x128xf32>
    %82 = arith.truncf %81 : vector<8x128xf32> to vector<8x128xbf16>
    %cst_29 = arith.constant dense<0.000000e+00> : vector<8x128xf32>
    %83 = tpu.matmul %82, %2, %cst_29 {dimension_numbers = #tpu.dot_dimension_numbers<[1], [0], [0], [1], [0, 0, 1, 1], [], []>} : vector<8x128xbf16>, vector<128x128xbf16>, vector<8x128xf32> -> vector<8x128xf32>
    %84 = vector.broadcast %5 : vector<1x128xf32> to vector<8x128xf32>
    %85 = arith.addf %83, %84 : vector<8x128xf32>
    %cst_30 = arith.constant 0.000000e+00 : f32
    %86 = vector.broadcast %cst_30 : f32 to vector<8x128xf32>
    %87 = arith.maximumf %85, %86 : vector<8x128xf32>
    %88 = arith.mulf %85, %7 : vector<8x128xf32>
    %89 = arith.subf %87, %88 : vector<8x128xf32>
    %90 = math.absf %85 : vector<8x128xf32>
    %cst_31 = arith.constant 0.000000e+00 : f32
    %91 = vector.broadcast %cst_31 : f32 to vector<8x128xf32>
    %92 = arith.subf %91, %90 : vector<8x128xf32>
    %93 = math.exp %92 : vector<8x128xf32>
    %94 = math.log1p %93 : vector<8x128xf32>
    %95 = arith.addf %89, %94 : vector<8x128xf32>
    %c10_i32 = arith.constant 10 : i32
    %96 = vector.broadcast %c10_i32 : i32 to vector<8x128xi32>
    %97 = arith.cmpi slt, %8, %96 : vector<8x128xi32>
    %cst_32 = arith.constant 0.000000e+00 : f32
    %98 = vector.broadcast %cst_32 : f32 to vector<8x128xf32>
    %99 = arith.select %97, %95, %98 : vector<8x128xi1>, vector<8x128xf32>
    %100 = vector.shape_cast %99 : vector<8x128xf32> to vector<1x8x128xf32>
    %cst_33 = arith.constant dense<0.000000e+00> : vector<1xf32>
    %101 = vector.multi_reduction <add>, %100, %cst_33 [1, 2] : vector<1x8x128xf32> to vector<1xf32>
    %102 = vector.shape_cast %101 : vector<1xf32> to vector<1x1x1xf32>
    %103 = vector.extract %102[0, 0, 0] : f32 from vector<1x1x1xf32>
    %cst_34 = arith.constant 8.000000e+01 : f32
    %104 = arith.divf %103, %cst_34 : f32
    %c10_i32_35 = arith.constant 10 : i32
    %105 = vector.broadcast %c10_i32_35 : i32 to vector<8x128xi32>
    %106 = arith.cmpi eq, %8, %105 : vector<8x128xi32>
    %107 = vector.broadcast %104 : f32 to vector<8x128xf32>
    %108 = arith.select %106, %107, %85 : vector<8x128xi1>, vector<8x128xf32>
    %c0_36 = arith.constant 0 : index
    %c0_37 = arith.constant 0 : index
    %109 = vector.load %arg3[%c0_36, %c0_37] : memref<8x128xf32, #tpu.memory_space<vmem>>, vector<8x128xf32>
    tpu.vector_store %arg3[%c0_36, %c0_37], %108 {strides = array<i32>} : memref<8x128xf32, #tpu.memory_space<vmem>>, vector<8x128xf32>,
    return
  }
}

</mosaic_0001>

<bundles_post_ra>
// kernel: ffnn_forward.1
= control target key start
LH: loop header
LB: loop body
LE: loop exit
PB: predicated region body
PF: predicated region fallthrough
CT: control target
= control target key end

     0   :  { %8 = vsyncpa [#allocation3], 0  ;;  %s638_s12 = smov [#allocation2]   ;;  %s728_s0 = inlined_call_operand.vmem [shape: f32[16,128], index: 0, kind: input, shape index: {}]   ;;  %s729_s1 = inlined_call_operand.hbm [shape: bf16[384,128], index: 1, kind: input, shape index: {}]   ;;  %s730_s2 = inlined_call_operand.vmem [shape: f32[8,128], index: 2, kind: input, shape index: {}]   ;;  %s731_s3 = inlined_call_operand.vmem [shape: f32[8,128], index: 3, kind: output, shape index: {}]  }
   0x1   :  { %s16_s13 = sshll.u32 %s638_s12, 4  ;;  %s614_s16 = scalar_lea.hbm %s729_s1, 3072  ;;  %s17_s13 = int_to_ptr.vmem [resolvable:$true] %s16_s13 }
   0x2   :  { %p615_p0 = scmp.ne.s32.totalorder %s729_s1, %s614_s16  ;;  %p618_p1 = scmp.lt.u32.totalorder %s614_s16, %s729_s1 }
   0x4   :  { %p620_p2 = pnand %p618_p1, %p615_p0 }
   0x6   :  { %623 = shalt.err (!%p620_p2)
}
   0x7   :  { %s624_s21 = scalar_lea.vmem %s17_s13, 3072  ;;  %p629_p4 = scmp.lt.s32.totalorder %s17_s13, %s17_s13 }
   0x8   :  { %p625_p3 = scmp.ne.s32.totalorder %s17_s13, %s624_s21  ;;  %p630_p5 = scmp.lt.s32.totalorder %s624_s21, %s624_s21 }
   0xa   :  { %p631_p6 = por %p630_p5, %p629_p4 }
   0xc   :  { %p632_p7 = pnand %p631_p6, %p625_p3 }
   0xe   :  { %635 = shalt.err (!%p632_p7)
}
   0xf   :  { %s639_s22 = smov 64   ;;  %s640_s23 = smov 4  }
  0x10   :  { %22 = dma.hbm_to_vmem [thread:$0]  %s729_s1, 3072, %s17_s13, [#allocation3], %s639_s22, %s639_s22, %s640_s23  }
  0x11   :  { %636 = dma.done.wait [#allocation3], 3072  }
  0x12   :  { %637 = vsyncadd [#allocation3], 4294964224  ;;  %v641_v0 = vmov 0.0   ;;  %v80_v1 = vld [vmem:[%s728_s0] sm:$0xff]  ;;  %v577_v4 = vld [vmem:[#allocation2 + $0x8] sm:$0xff]   ;;  %vm642_vm0 = vmmov 0   ;;  %v82_v60 = vlaneseq }
  0x13   :  { %509 = vmatprep.subr.bf16.mxu0 %v641_v0  ;;  %529 = vmatprep.subr.bf16.mxu1 %v641_v0  ;;  %v86_v2 = vmul.f32 %v80_v1, %v80_v1  ;;  %v576_v3 = vld [vmem:[#allocation2] sm:$0xff]   ;;  %v578_v5 = vld [vmem:[#allocation2 + $0x10] sm:$0xff]   ;;  %v579_v6 = vld [vmem:[#allocation2 + $0x18] sm:$0xff]  }
  0x14   :  { %84 = vadd.xlane.f32.xlu0 %v80_v1  ;;  %510 = vmatpush3.bf16.msra.mxu0 %v576_v3  ;;  %v580_v7 = vld [vmem:[#allocation2 + $0x20] sm:$0xff]   ;;  %v581_v8 = vld [vmem:[#allocation2 + $0x28] sm:$0xff]   ;;  %v582_v9 = vld [vmem:[#allocation2 + $0x30] sm:$0xff]   ;;  %v709_v61 = vand.u32 127, %v82_v60 }
  0x15   :  { %511 = vmatprep.subr.bf16.mxu0 %v641_v0  ;;  %525 = vmatprep.mubr.msk.bf16.mxu0 %vm642_vm0, %v641_v0  ;;  %v583_v10 = vld [vmem:[#allocation2 + $0x38] sm:$0xff]   ;;  %v584_v22 = vld [vmem:[#allocation2 + $0x40] sm:$0xff]   ;;  %v585_v23 = vld [vmem:[#allocation2 + $0x48] sm:$0xff]  }
  0x16   :  { %545 = vmatprep.mubr.msk.bf16.mxu1 %vm642_vm0, %v641_v0  ;;  %530 = vmatpush3.bf16.msra.mxu1 %v584_v22  ;;  %v454_v24 = vld [vmem:[%s730_s2] ss:$0 sm:$0xff]  ;;  %v586_v32 = vld [vmem:[#allocation2 + $0x50] sm:$0xff]   ;;  %v587_v33 = vld [vmem:[#allocation2 + $0x58] sm:$0xff]   ;;  %vm299_vm1 = vcmp.lt.s32.totalorder %v709_v61, 16  ;;  %vm431_vm3 = vcmp.lt.s32.totalorder %v709_v61, 10 }
  0x17   :  { %531 = vmatprep.subr.bf16.mxu1 %v641_v0  ;;  %v588_v34 = vld [vmem:[#allocation2 + $0x60] sm:$0xff]   ;;  %v589_v35 = vld [vmem:[#allocation2 + $0x68] sm:$0xff]   ;;  %v590_v36 = vld [vmem:[#allocation2 + $0x70] sm:$0xff]   ;;  %vm445_vm4 = vcmp.eq.s32.totalorder %v709_v61, 10 }
  0x18   :  { %87 = vadd.xlane.f32.xlu0 %v86_v2  ;;  %512 = vmatpush3.bf16.msra.mxu0 %v577_v4  ;;  %v591_v37 = vld [vmem:[#allocation2 + $0x78] sm:$0xff]   ;;  %v592_v49 = vld [vmem:[#allocation2 + $0x80] sm:$0xff]   ;;  %v593_v50 = vld [vmem:[#allocation2 + $0x88] sm:$0xff]  }
  0x19   :  { %513 = vmatprep.subr.bf16.mxu0 %v641_v0  ;;  %v463_v51 = vld [vmem:[%s730_s2 + $0x1] ss:$0 sm:$0xff]  ;;  %v594_v2 = vld [vmem:[#allocation2 + $0x90] sm:$0xff]   ;;  %v595_v3 = vld [vmem:[#allocation2 + $0x98] sm:$0xff]  }
  0x1a   :  { %532 = vmatpush3.bf16.msra.mxu1 %v585_v23  ;;  %v596_v4 = vld [vmem:[#allocation2 + $0xa0] sm:$0xff]  }
  0x1b   :  { %533 = vmatprep.subr.bf16.mxu1 %v641_v0 }
  0x1c   :  { %514 = vmatpush3.bf16.msra.mxu0 %v578_v5  ;;  %v597_v5 = vld [vmem:[#allocation2 + $0xa8] sm:$0xff]  }
  0x1d   :  { %515 = vmatprep.subr.bf16.mxu0 %v641_v0 }
  0x1e   :  { %534 = vmatpush3.bf16.msra.mxu1 %v586_v32 }
  0x1f   :  { %535 = vmatprep.subr.bf16.mxu1 %v641_v0 }
  0x20   :  { %516 = vmatpush3.bf16.msra.mxu0 %v579_v6  ;;  %v598_v6 = vld [vmem:[#allocation2 + $0xb0] sm:$0xff]  }
  0x21   :  { %517 = vmatprep.subr.bf16.mxu0 %v641_v0 }
  0x22   :  { %536 = vmatpush3.bf16.msra.mxu1 %v587_v33 }
  0x23   :  { %537 = vmatprep.subr.bf16.mxu1 %v641_v0 }
  0x24   :  { %518 = vmatpush3.bf16.msra.mxu0 %v580_v7  ;;  %v599_v7 = vld [vmem:[#allocation2 + $0xb8] sm:$0xff]  }
  0x25   :  { %519 = vmatprep.subr.bf16.mxu0 %v641_v0 }
  0x26   :  { %538 = vmatpush3.bf16.msra.mxu1 %v588_v34 }
  0x27   :  { %539 = vmatprep.subr.bf16.mxu1 %v641_v0 }
  0x28   :  { %520 = vmatpush3.bf16.msra.mxu0 %v581_v8 }
  0x29   :  { %521 = vmatprep.subr.bf16.mxu0 %v641_v0 }
  0x2a   :  { %540 = vmatpush3.bf16.msra.mxu1 %v589_v35 }
  0x2b   :  { %541 = vmatprep.subr.bf16.mxu1 %v641_v0 }
  0x2c   :  { %522 = vmatpush3.bf16.msra.mxu0 %v582_v9 }
  0x2d   :  { %523 = vmatprep.subr.bf16.mxu0 %v641_v0 }
  0x2e   :  { %542 = vmatpush3.bf16.msra.mxu1 %v590_v36 }
  0x2f   :  { %543 = vmatprep.subr.bf16.mxu1 %v641_v0 }
  0x30   :  { %524 = vmatpush3.bf16.msra.mxu0 %v583_v10 }
  0x31   :  { %549 = vmatprep.subr.bf16.mxu0 %v641_v0 }
  0x32   :  { %544 = vmatpush3.bf16.msra.mxu1 %v591_v37 }
  0xa1   :  { %v85_v11 = vpop.xlane.xlu0 %84 }
  0xa2   :  { %v90_v12 = vmul.f32 0.03125, %v85_v11 }
  0xa4   :  { %v92_v14 = vmul.f32 %v90_v12, %v90_v12  ;;  %v94_v18 = vsub.f32 %v80_v1, %v90_v12 }
  0xa5   :  { %v88_v13 = vpop.xlane.xlu0 %87 }
  0xa6   :  { %v91_v15 = vmul.f32 0.03125, %v88_v13 }
  0xa8   :  { %v93_v16 = vsub.f32 %v91_v15, %v92_v14 }
  0xaa   :  { %v95_v17 = vadd.f32 1e-05, %v93_v16 }
  0xac   :  { %600 = vrsqrt.f32 %v95_v17 }
  0xb6   :  { %v601_v19 = vpop.eup %600 }
  0xb7   :  { %v97_v20 = vmul.f32 %v601_v19, %v94_v18  ;;  %v473_v19 = vld [vmem:[%s730_s2 + $0x2] ss:$0 sm:$0xff] }
  0xb9   :  { %v98_v21 = vpack.c.bf16 %v97_v20, %v97_v20 }
  0xbb   :  { %526 = vmatmul.mubr.bf16.vlgmr.msra.gmra.mrb[0].mxu0 %v98_v21 }
  0xbc   :  { %565 = vmatprep.mubr.msk.bf16.mxu0 %vm642_vm0, %v641_v0  ;;  %550 = vmatpush3.bf16.msra.mxu0 %v592_v49 }
  0xbd   :  { %551 = vmatprep.subr.bf16.mxu0 %v641_v0 }
  0xc0   :  { %552 = vmatpush3.bf16.msra.mxu0 %v593_v50 }
  0xc1   :  { %553 = vmatprep.subr.bf16.mxu0 %v641_v0 }
  0xc4   :  { %554 = vmatpush3.bf16.msra.mxu0 %v594_v2 }
  0xc5   :  { %555 = vmatprep.subr.bf16.mxu0 %v641_v0 }
  0xc8   :  { %556 = vmatpush3.bf16.msra.mxu0 %v595_v3 }
  0xc9   :  { %557 = vmatprep.subr.bf16.mxu0 %v641_v0 }
  0xcc   :  { %558 = vmatpush3.bf16.msra.mxu0 %v596_v4 }
  0xcd   :  { %559 = vmatprep.subr.bf16.mxu0 %v641_v0 }
  0xd0   :  { %560 = vmatpush3.bf16.msra.mxu0 %v597_v5 }
  0xd1   :  { %561 = vmatprep.subr.bf16.mxu0 %v641_v0 }
  0xd4   :  { %562 = vmatpush3.bf16.msra.mxu0 %v598_v6 }
  0xd5   :  { %563 = vmatprep.subr.bf16.mxu0 %v641_v0 }
  0xd8   :  { %564 = vmatpush3.bf16.msra.mxu0 %v599_v7 }
 0x18e   :  { %v185_v25 = vpop.f32.mrb[0].mxu0 }
 0x18f   :  { %v186_v26 = vadd.f32 %v454_v24, %v185_v25  ;;  %v527_v27 = vpop.f32.mrb[1].mxu0 }
 0x190   :  { %v188_v28 = vpop.f32.mrb[2].mxu0 }
 0x191   :  { %v191_v29 = vmax.f32 %v186_v26, 0.0  ;;  %v528_v30 = vpop.f32.mrb[3].mxu0 }
 0x192   :  { %v81_v30 = vld [vmem:[%s728_s0 + $0x8] sm:$0xff] }
 0x193   :  { %192 = vadd.xlane.f32.xlu1 %v191_v29  ;;  %v194_v31 = vmul.f32 %v191_v29, %v191_v29 }
 0x197   :  { %195 = vadd.xlane.f32.xlu1 %v194_v31 }
 0x220   :  { %v193_v38 = vpop.xlane.xlu1 %192 }
 0x221   :  { %v198_v39 = vmul.f32 0.015625, %v193_v38 }
 0x223   :  { %v200_v41 = vmul.f32 %v198_v39, %v198_v39  ;;  %v202_v45 = vsub.f32 %v191_v29, %v198_v39 }
 0x224   :  { %v196_v40 = vpop.xlane.xlu1 %195 }
 0x225   :  { %v199_v42 = vmul.f32 0.015625, %v196_v40 }
 0x227   :  { %v201_v43 = vsub.f32 %v199_v42, %v200_v41 }
 0x229   :  { %v203_v44 = vadd.f32 1e-05, %v201_v43 }
 0x22b   :  { %602 = vrsqrt.f32 %v203_v44 }
 0x235   :  { %v603_v46 = vpop.eup %602 }
 0x236   :  { %v205_v47 = vmul.f32 %v603_v46, %v202_v45 }
 0x238   :  { %v206_v48 = vpack.c.bf16 %v205_v47, %v205_v47 }
 0x23a   :  { %546 = vmatmul.mubr.bf16.vlgmr.msra.gmra.mrb[0].mxu1 %v206_v48 }
 0x30d   :  { %v293_v52 = vpop.f32.mrb[0].mxu1 }
 0x30e   :  { %v294_v53 = vadd.f32 %v463_v51, %v293_v52  ;;  %v547_v54 = vpop.f32.mrb[1].mxu1 }
 0x30f   :  { %v296_v55 = vpop.f32.mrb[2].mxu1 }
 0x310   :  { %v472_v56 = vmul.f32 -1.442695, %v294_v53  ;;  %v548_v57 = vpop.f32.mrb[3].mxu1 }
 0x312   :  { %604 = vpow2.f32 %v472_v56 }
 0x31c   :  { %v605_v58 = vpop.eup %604 }
 0x31d   :  { %v303_v59 = vadd.f32 1.0, %v605_v58 }
 0x31f   :  { %606 = vrcp.f32 %v303_v59 }
 0x329   :  { %v607_v62 = vpop.eup %606 }
 0x32a   :  { %v306_v63 = vsel %vm299_vm1, %v607_v62, 0.0 }
 0x32b   :  { %307 = vadd.xlane.f32.xlu0 %v306_v63  ;;  %v309_v1 = vmul.f32 %v306_v63, %v306_v63 }
 0x32d   :  { %310 = vadd.xlane.f32.xlu1 %v309_v1 }
 0x3b8   :  { %v308_v8 = vpop.xlane.xlu0 %307 }
 0x3b9   :  { %v313_v9 = vmul.f32 0.0625, %v308_v8 }
 0x3ba   :  { %v311_v10 = vpop.xlane.xlu1 %310 }
 0x3bb   :  { %v315_v11 = vmul.f32 %v313_v9, %v313_v9  ;;  %v314_v12 = vmul.f32 0.0625, %v311_v10  ;;  %v317_v15 = vsub.f32 %v306_v63, %v313_v9 }
 0x3bd   :  { %v316_v13 = vsub.f32 %v314_v12, %v315_v11 }
 0x3bf   :  { %v318_v14 = vadd.f32 1e-05, %v316_v13 }
 0x3c1   :  { %608 = vrsqrt.f32 %v318_v14 }
 0x3cb   :  { %v609_v16 = vpop.eup %608 }
 0x3cc   :  { %v320_v17 = vmul.f32 %v609_v16, %v317_v15 }
 0x3ce   :  { %v321_v18 = vpack.c.bf16 %v320_v17, %v320_v17 }
 0x3d0   :  { %566 = vmatmul.mubr.bf16.vlgmr.msra.gmra.mrb[4].mxu0 %v321_v18 }
 0x4a3   :  { %v408_v20 = vpop.f32.mrb[4].mxu0 }
 0x4a4   :  { %v409_v0 = vadd.f32 %v473_v19, %v408_v20  ;;  %v567_v21 = vpop.f32.mrb[5].mxu0 }
 0x4a5   :  { %v411_v22 = vpop.f32.mrb[6].mxu0 }
 0x4a6   :  { %v417_v23 = vand.u32 2147483647, %v409_v0  ;;  %v568_v24 = vpop.f32.mrb[7].mxu0  ;;  %v414_v32 = vmax.f32 %v409_v0, 0.0  ;;  %v415_v33 = vmul.f32 %v409_v0, %v81_v30 }
 0x4a8   :  { %v418_v25 = vsub.f32 0.0, %v417_v23  ;;  %v416_v38 = vsub.f32 %v414_v32, %v415_v33 }
 0x4aa   :  { %v419_v26 = vmul.f32 1.442695, %v418_v25 }
 0x4ac   :  { %610 = vpow2.f32 %v419_v26 }
 0x4b6   :  { %v611_v27 = vpop.eup %610 }
 0x4b7   :  { %v421_v28 = vadd.f32 1.0, %v611_v27  ;;  %v424_v29 = vmul.f32 -0.5, %v611_v27  ;;  %v427_v34 = vand.u32 2147483647, %v611_v27 }
 0x4b9   :  { %612 = vlog2.f32 %v421_v28  ;;  %v425_v31 = vadd.f32 1.0, %v424_v29  ;;  %vm428_vm2 = vcmp.lt.f32.partialorder %v427_v34, 0.0004427343 }
 0x4bb   :  { %v426_v37 = vmul.f32 %v611_v27, %v425_v31 }
 0x4c3   :  { %v613_v35 = vpop.eup %612 }
 0x4c4   :  { %v423_v36 = vmul.f32 0.6931472, %v613_v35 }
 0x4c6   :  { %v429_v39 = vsel %vm428_vm2, %v426_v37, %v423_v36 }
 0x4c7   :  { %v430_v40 = vadd.f32 %v429_v39, %v416_v38 }
 0x4c9   :  { %v432_v41 = vsel %vm431_vm3, %v430_v40, 0.0 }
 0x4ca   :  { %433 = vadd.xlane.f32.xlu0 %v432_v41 }
 0x557   :  { %v434_v42 = vpop.xlane.xlu0 %433 }
 0x558   :  { %v435_v43 = vrot.slane %v434_v42, 4 }
 0x55a   :  { %v436_v44 = vadd.f32 %v435_v43, %v434_v42 }
 0x55c   :  { %v437_v45 = vrot.slane %v436_v44, 2 }
 0x55e   :  { %v438_v46 = vadd.f32 %v437_v45, %v436_v44 }
 0x560   :  { %v439_v47 = vrot.slane %v438_v46, 1 }
 0x562   :  { %v440_v48 = vadd.f32 %v439_v47, %v438_v46 }
 0x564   :  { %569 = vpush %v440_v48 }
 0x595   :  { %s570_s0 = spop %569 }
 0x596   :  { %s444_s2 = smul.f32 0.0125, %s570_s0 }
 0x598   :  { %v446_v49 = vstv %s444_s2 }
 0x599   :  { %v447_v50 = vsel %vm445_vm4, %v446_v49, %v409_v0 }
 0x59a   :  { %448 = vst [vmem:[%s731_s3] sm:$0xff] %v447_v50 }
 0x59b   :  { %453 = vsyncpa [#allocation3], 1 }

</bundles_post_ra>
